<compile_context>
chip_gen: v7x
topology: tpu7x:2x2x1
jax: 0.10.0
libtpu: 0.0.40
codegen_flags: <defaults>
</compile_context>

<pallas_src>
import functools

import jax
import jax.numpy as jnp
from jax import lax
from jax.experimental import pallas as pl
from jax.experimental.pallas import tpu as pltpu


def _image_projection_kernel(x_ref, w_ref, b_ref, g_ref, beta_ref, o_ref):
    # Wide MXU matmul: (B, D_in) @ (D_in, k*C), f32 accumulation.
    y = jnp.dot(x_ref[...], w_ref[...], preferred_element_type=jnp.float32)
    y = y + b_ref[...]                      # bias kept in f32

    C = g_ref.shape[-1]
    k = y.shape[-1] // C
    gamma = g_ref[...]
    beta = beta_ref[...]

    # LayerNorm over each C-wide column group (one "image text embed" each).
    # Static, 128-aligned lane slices; the k-way loop is fully unrolled and
    # its VPU/XLU work hides under the HBM-bound weight DMA.
    for i in range(k):
        yi = y[:, i * C:(i + 1) * C]
        mean = jnp.mean(yi, axis=-1, keepdims=True)
        yc = yi - mean
        var = jnp.mean(yc * yc, axis=-1, keepdims=True)
        inv = lax.rsqrt(var + 1e-5)         # PyTorch LayerNorm default eps
        o_ref[:, i * C:(i + 1) * C] = (yc * inv * gamma + beta).astype(o_ref.dtype)


def _pick_group_size(N, B, D_in, C, w_itemsize,
                     budget_bytes=24 * 1024 * 1024):
    """Widest k (divisor of N) whose double-buffered tiles fit the VMEM budget,
    preferring >= 2 grid steps (v7x has two TensorCores per chip)."""

    def vmem_bytes(k):
        return (2 * D_in * k * C * w_itemsize   # double-buffered W tile (dominant)
                + 6 * B * k * C * 4             # out tile + f32 temporaries
                + 2 * k * C * 4                 # bias tile
                + 2 * B * D_in * w_itemsize)    # x tile

    divisors = [k for k in range(1, N + 1) if N % k == 0]
    # (8,128) lane rule for the (B, k*C)/(1, k*C) blocks unless full-width.
    valid = [k for k in divisors if (k * C) % 128 == 0 or k == N]
    fitting = [k for k in valid if vmem_bytes(k) <= budget_bytes]
    if not fitting:
        fitting = [min(valid)]
    multi = [k for k in fitting if N // k >= 2]
    return max(multi) if multi else max(fitting)


def image_projection(x, weight, bias, gamma, beta, *,
                     num_image_text_embeds,
                     compute_dtype=jnp.bfloat16):
    """x: (B, D_in); weight: (D_in, N*C) [= PyTorch weight.T]; bias: (N*C,);
    gamma/beta: (C,).  Returns (B, N, C)."""
    B, D_in = x.shape
    N = num_image_text_embeds
    NC = weight.shape[1]
    C = NC // N

    w_itemsize = jnp.dtype(compute_dtype).itemsize
    k = _pick_group_size(N, B, D_in, C, w_itemsize)
    G = N // k
    kC = k * C

    # Pre-arrange W so each grid step's (D_in, k*C) block is one contiguous
    # HBM region, and stream it (and x) in the low-precision compute dtype.
    # (In a real model this re-layout / cast is done once at load time.)
    w_grouped = weight.reshape(D_in, G, kC).transpose(1, 0, 2).astype(compute_dtype)
    x_lp = x.astype(compute_dtype)
    bias2 = bias.reshape(1, NC).astype(jnp.float32)
    gamma2 = gamma.reshape(1, C).astype(jnp.float32)
    beta2 = beta.reshape(1, C).astype(jnp.float32)

    out_itemsize = jnp.dtype(x.dtype).itemsize
    cost = pl.CostEstimate(
        flops=2 * B * D_in * NC,
        transcendentals=0,
        bytes_accessed=(D_in * NC * w_itemsize        # weight stream (the limiter)
                        + B * D_in * w_itemsize       # x
                        + NC * 4 + 2 * C * 4          # bias, gamma, beta
                        + B * NC * out_itemsize))     # output

    out_flat = pl.pallas_call(
        _image_projection_kernel,
        out_shape=jax.ShapeDtypeStruct((B, NC), x.dtype),
        grid_spec=pl.GridSpec(
            grid=(G,),
            in_specs=[
                pl.BlockSpec((B, D_in), lambda j: (0, 0)),            # x (resident)
                pl.BlockSpec((pl.Squeezed(), D_in, kC),
                             lambda j: (j, 0, 0)),                    # contiguous W block
                pl.BlockSpec((1, kC), lambda j: (0, j)),              # bias block
                pl.BlockSpec((1, C), lambda j: (0, 0)),               # gamma
                pl.BlockSpec((1, C), lambda j: (0, 0)),               # beta
            ],
            out_specs=pl.BlockSpec((B, kC), lambda j: (0, j)),        # lane-dense out
        ),
        compiler_params=pltpu.CompilerParams(
            dimension_semantics=("parallel",),
            vmem_limit_bytes=32 * 1024 * 1024),
        cost_estimate=cost,
    )(x_lp, w_grouped, bias2, gamma2, beta2)

    # reshape(B, N, C): contiguous split of the last dim, same as PyTorch.
    return out_flat.reshape(B, N, C)


def _reference(x, weight, bias, gamma, beta, num_image_text_embeds):
    B = x.shape[0]
    y = x @ weight + bias
    y = y.reshape(B, num_image_text_embeds, -1)
    mean = jnp.mean(y, axis=-1, keepdims=True)
    var = jnp.mean((y - mean) ** 2, axis=-1, keepdims=True)
    return (y - mean) * lax.rsqrt(var + 1e-5) * gamma + beta


if __name__ == "__main__":
    # Small shapes consistent with the module's forward.
    batch = 2
    image_embed_dim = 64
    cross_attention_dim = 128
    num_image_text_embeds = 8

    key = jax.random.PRNGKey(0)
    k_x, k_w, k_b, k_g, k_be = jax.random.split(key, 5)

    x = jax.random.normal(k_x, (batch, image_embed_dim), dtype=jnp.float32)
    # Deterministic synthetic parameters (no checkpoint load).
    weight = jax.random.normal(
        k_w, (image_embed_dim, num_image_text_embeds * cross_attention_dim),
        dtype=jnp.float32) * (1.0 / image_embed_dim ** 0.5)
    bias = jax.random.normal(
        k_b, (num_image_text_embeds * cross_attention_dim,), dtype=jnp.float32) * 0.02
    gamma = 1.0 + 0.1 * jax.random.normal(k_g, (cross_attention_dim,), dtype=jnp.float32)
    beta = 0.1 * jax.random.normal(k_be, (cross_attention_dim,), dtype=jnp.float32)

    ref = _reference(x, weight, bias, gamma, beta, num_image_text_embeds)

    # f32 streaming path: tight check of the kernel math.
    out_f32 = image_projection(x, weight, bias, gamma, beta,
                               num_image_text_embeds=num_image_text_embeds,
                               compute_dtype=jnp.float32)
    out_f32 = jax.block_until_ready(out_f32)
    assert out_f32.shape == (batch, num_image_text_embeds, cross_attention_dim)
    assert jnp.allclose(out_f32, ref, atol=2e-4, rtol=2e-4)

    # bf16 streaming path (production config): looser tolerance from the
    # bf16 cast of x/W; LayerNorm itself stays f32.
    out_bf16 = image_projection(x, weight, bias, gamma, beta,
                                num_image_text_embeds=num_image_text_embeds,
                                compute_dtype=jnp.bfloat16)
    out_bf16 = jax.block_until_ready(out_bf16)
    assert out_bf16.shape == (batch, num_image_text_embeds, cross_attention_dim)
    assert jnp.allclose(out_bf16, ref, atol=5e-2, rtol=5e-2)

    print("KERNEL_OK")
</pallas_src>

<mosaic_0001>
module attributes {stable_mosaic.version = 11 : i64} {
  func.func @_image_projection_kernel(%arg0: i32, %arg1: memref<2x64xf32, #tpu.memory_space<vmem>>, %arg2: memref<1x64x512xf32, #tpu.memory_space<vmem>>, %arg3: memref<1x512xf32, #tpu.memory_space<vmem>>, %arg4: memref<1x128xf32, #tpu.memory_space<vmem>>, %arg5: memref<1x128xf32, #tpu.memory_space<vmem>>, %arg6: memref<2x512xf32, #tpu.memory_space<vmem>>) attributes {dimension_semantics = [#tpu.dimension_semantics<parallel>], iteration_bounds = array<i64: 2>, scalar_prefetch = 0 : i64, scratch_operands = 0 : i64, tpu.core_type = #tpu.core_type<tc>, window_params = [{pipeline_mode = #tpu.pipeline_mode<synchronous>, transform_indices = @transform_0, window_bounds = array<i64: 2, 64>}, {transform_indices = @transform_1, window_bounds = array<i64: 1, 64, 512>}, {transform_indices = @transform_2, window_bounds = array<i64: 1, 512>}, {pipeline_mode = #tpu.pipeline_mode<synchronous>, transform_indices = @transform_3, window_bounds = array<i64: 1, 128>}, {pipeline_mode = #tpu.pipeline_mode<synchronous>, transform_indices = @transform_4, window_bounds = array<i64: 1, 128>}, {transform_indices = @transform_5, window_bounds = array<i64: 2, 512>}]} {
    %c0 = arith.constant 0 : index
    %c0_0 = arith.constant 0 : index
    %0 = vector.load %arg1[%c0, %c0_0] : memref<2x64xf32, #tpu.memory_space<vmem>>, vector<2x64xf32>
    %c0_1 = arith.constant 0 : index
    %c0_2 = arith.constant 0 : index
    %c0_3 = arith.constant 0 : index
    %1 = vector.load %arg2[%c0_1, %c0_2, %c0_3] : memref<1x64x512xf32, #tpu.memory_space<vmem>>, vector<1x64x512xf32>
    %2 = vector.shape_cast %1 : vector<1x64x512xf32> to vector<64x512xf32>
    %cst = arith.constant dense<0.000000e+00> : vector<2x512xf32>
    %3 = tpu.matmul %0, %2, %cst {dimension_numbers = #tpu.dot_dimension_numbers<[1], [0], [0], [1], [0, 0, 1, 1], [], []>} : vector<2x64xf32>, vector<64x512xf32>, vector<2x512xf32> -> vector<2x512xf32>
    %c0_4 = arith.constant 0 : index
    %c0_5 = arith.constant 0 : index
    %4 = vector.load %arg3[%c0_4, %c0_5] : memref<1x512xf32, #tpu.memory_space<vmem>>, vector<1x512xf32>
    %5 = vector.broadcast %4 : vector<1x512xf32> to vector<2x512xf32>
    %6 = arith.addf %3, %5 : vector<2x512xf32>
    %c0_6 = arith.constant 0 : index
    %c0_7 = arith.constant 0 : index
    %7 = vector.load %arg4[%c0_6, %c0_7] : memref<1x128xf32, #tpu.memory_space<vmem>>, vector<1x128xf32>
    %c0_8 = arith.constant 0 : index
    %c0_9 = arith.constant 0 : index
    %8 = vector.load %arg5[%c0_8, %c0_9] : memref<1x128xf32, #tpu.memory_space<vmem>>, vector<1x128xf32>
    %9 = vector.extract_strided_slice %6 {offsets = [0, 0], sizes = [2, 128], strides = [1, 1]} : vector<2x512xf32> to vector<2x128xf32>
    %cst_10 = arith.constant dense<0.000000e+00> : vector<2xf32>
    %10 = vector.multi_reduction <add>, %9, %cst_10 [1] : vector<2x128xf32> to vector<2xf32>
    %11 = vector.shape_cast %10 : vector<2xf32> to vector<2x1xf32>
    %cst_11 = arith.constant 1.280000e+02 : f32
    %12 = vector.broadcast %cst_11 : f32 to vector<2x1xf32>
    %13 = arith.divf %11, %12 : vector<2x1xf32>
    %14 = vector.broadcast %13 : vector<2x1xf32> to vector<2x128xf32>
    %15 = arith.subf %9, %14 : vector<2x128xf32>
    %16 = arith.mulf %15, %15 : vector<2x128xf32>
    %cst_12 = arith.constant dense<0.000000e+00> : vector<2xf32>
    %17 = vector.multi_reduction <add>, %16, %cst_12 [1] : vector<2x128xf32> to vector<2xf32>
    %18 = vector.shape_cast %17 : vector<2xf32> to vector<2x1xf32>
    %cst_13 = arith.constant 1.280000e+02 : f32
    %19 = vector.broadcast %cst_13 : f32 to vector<2x1xf32>
    %20 = arith.divf %18, %19 : vector<2x1xf32>
    %cst_14 = arith.constant 9.99999974E-6 : f32
    %21 = vector.broadcast %cst_14 : f32 to vector<2x1xf32>
    %22 = arith.addf %20, %21 : vector<2x1xf32>
    %23 = math.rsqrt %22 : vector<2x1xf32>
    %24 = vector.broadcast %23 : vector<2x1xf32> to vector<2x128xf32>
    %25 = arith.mulf %15, %24 : vector<2x128xf32>
    %26 = vector.broadcast %7 : vector<1x128xf32> to vector<2x128xf32>
    %27 = arith.mulf %25, %26 : vector<2x128xf32>
    %28 = vector.broadcast %8 : vector<1x128xf32> to vector<2x128xf32>
    %29 = arith.addf %27, %28 : vector<2x128xf32>
    %c0_15 = arith.constant 0 : index
    %c0_16 = arith.constant 0 : index
    %30 = vector.load %arg6[%c0_15, %c0_16] : memref<2x512xf32, #tpu.memory_space<vmem>>, vector<2x128xf32>
    tpu.vector_store %arg6[%c0_15, %c0_16], %29 {strides = array<i32>} : memref<2x512xf32, #tpu.memory_space<vmem>>, vector<2x128xf32>,
    %31 = vector.extract_strided_slice %6 {offsets = [0, 128], sizes = [2, 128], strides = [1, 1]} : vector<2x512xf32> to vector<2x128xf32>
    %cst_17 = arith.constant dense<0.000000e+00> : vector<2xf32>
    %32 = vector.multi_reduction <add>, %31, %cst_17 [1] : vector<2x128xf32> to vector<2xf32>
    %33 = vector.shape_cast %32 : vector<2xf32> to vector<2x1xf32>
    %cst_18 = arith.constant 1.280000e+02 : f32
    %34 = vector.broadcast %cst_18 : f32 to vector<2x1xf32>
    %35 = arith.divf %33, %34 : vector<2x1xf32>
    %36 = vector.broadcast %35 : vector<2x1xf32> to vector<2x128xf32>
    %37 = arith.subf %31, %36 : vector<2x128xf32>
    %38 = arith.mulf %37, %37 : vector<2x128xf32>
    %cst_19 = arith.constant dense<0.000000e+00> : vector<2xf32>
    %39 = vector.multi_reduction <add>, %38, %cst_19 [1] : vector<2x128xf32> to vector<2xf32>
    %40 = vector.shape_cast %39 : vector<2xf32> to vector<2x1xf32>
    %cst_20 = arith.constant 1.280000e+02 : f32
    %41 = vector.broadcast %cst_20 : f32 to vector<2x1xf32>
    %42 = arith.divf %40, %41 : vector<2x1xf32>
    %cst_21 = arith.constant 9.99999974E-6 : f32
    %43 = vector.broadcast %cst_21 : f32 to vector<2x1xf32>
    %44 = arith.addf %42, %43 : vector<2x1xf32>
    %45 = math.rsqrt %44 : vector<2x1xf32>
    %46 = vector.broadcast %45 : vector<2x1xf32> to vector<2x128xf32>
    %47 = arith.mulf %37, %46 : vector<2x128xf32>
    %48 = vector.broadcast %7 : vector<1x128xf32> to vector<2x128xf32>
    %49 = arith.mulf %47, %48 : vector<2x128xf32>
    %50 = vector.broadcast %8 : vector<1x128xf32> to vector<2x128xf32>
    %51 = arith.addf %49, %50 : vector<2x128xf32>
    %c0_22 = arith.constant 0 : index
    %c128 = arith.constant 128 : index
    %52 = vector.load %arg6[%c0_22, %c128] : memref<2x512xf32, #tpu.memory_space<vmem>>, vector<2x128xf32>
    tpu.vector_store %arg6[%c0_22, %c128], %51 {strides = array<i32>} : memref<2x512xf32, #tpu.memory_space<vmem>>, vector<2x128xf32>,
    %53 = vector.extract_strided_slice %6 {offsets = [0, 256], sizes = [2, 128], strides = [1, 1]} : vector<2x512xf32> to vector<2x128xf32>
    %cst_23 = arith.constant dense<0.000000e+00> : vector<2xf32>
    %54 = vector.multi_reduction <add>, %53, %cst_23 [1] : vector<2x128xf32> to vector<2xf32>
    %55 = vector.shape_cast %54 : vector<2xf32> to vector<2x1xf32>
    %cst_24 = arith.constant 1.280000e+02 : f32
    %56 = vector.broadcast %cst_24 : f32 to vector<2x1xf32>
    %57 = arith.divf %55, %56 : vector<2x1xf32>
    %58 = vector.broadcast %57 : vector<2x1xf32> to vector<2x128xf32>
    %59 = arith.subf %53, %58 : vector<2x128xf32>
    %60 = arith.mulf %59, %59 : vector<2x128xf32>
    %cst_25 = arith.constant dense<0.000000e+00> : vector<2xf32>
    %61 = vector.multi_reduction <add>, %60, %cst_25 [1] : vector<2x128xf32> to vector<2xf32>
    %62 = vector.shape_cast %61 : vector<2xf32> to vector<2x1xf32>
    %cst_26 = arith.constant 1.280000e+02 : f32
    %63 = vector.broadcast %cst_26 : f32 to vector<2x1xf32>
    %64 = arith.divf %62, %63 : vector<2x1xf32>
    %cst_27 = arith.constant 9.99999974E-6 : f32
    %65 = vector.broadcast %cst_27 : f32 to vector<2x1xf32>
    %66 = arith.addf %64, %65 : vector<2x1xf32>
    %67 = math.rsqrt %66 : vector<2x1xf32>
    %68 = vector.broadcast %67 : vector<2x1xf32> to vector<2x128xf32>
    %69 = arith.mulf %59, %68 : vector<2x128xf32>
    %70 = vector.broadcast %7 : vector<1x128xf32> to vector<2x128xf32>
    %71 = arith.mulf %69, %70 : vector<2x128xf32>
    %72 = vector.broadcast %8 : vector<1x128xf32> to vector<2x128xf32>
    %73 = arith.addf %71, %72 : vector<2x128xf32>
    %c0_28 = arith.constant 0 : index
    %c256 = arith.constant 256 : index
    %74 = vector.load %arg6[%c0_28, %c256] : memref<2x512xf32, #tpu.memory_space<vmem>>, vector<2x128xf32>
    tpu.vector_store %arg6[%c0_28, %c256], %73 {strides = array<i32>} : memref<2x512xf32, #tpu.memory_space<vmem>>, vector<2x128xf32>,
    %75 = vector.extract_strided_slice %6 {offsets = [0, 384], sizes = [2, 128], strides = [1, 1]} : vector<2x512xf32> to vector<2x128xf32>
    %cst_29 = arith.constant dense<0.000000e+00> : vector<2xf32>
    %76 = vector.multi_reduction <add>, %75, %cst_29 [1] : vector<2x128xf32> to vector<2xf32>
    %77 = vector.shape_cast %76 : vector<2xf32> to vector<2x1xf32>
    %cst_30 = arith.constant 1.280000e+02 : f32
    %78 = vector.broadcast %cst_30 : f32 to vector<2x1xf32>
    %79 = arith.divf %77, %78 : vector<2x1xf32>
    %80 = vector.broadcast %79 : vector<2x1xf32> to vector<2x128xf32>
    %81 = arith.subf %75, %80 : vector<2x128xf32>
    %82 = arith.mulf %81, %81 : vector<2x128xf32>
    %cst_31 = arith.constant dense<0.000000e+00> : vector<2xf32>
    %83 = vector.multi_reduction <add>, %82, %cst_31 [1] : vector<2x128xf32> to vector<2xf32>
    %84 = vector.shape_cast %83 : vector<2xf32> to vector<2x1xf32>
    %cst_32 = arith.constant 1.280000e+02 : f32
    %85 = vector.broadcast %cst_32 : f32 to vector<2x1xf32>
    %86 = arith.divf %84, %85 : vector<2x1xf32>
    %cst_33 = arith.constant 9.99999974E-6 : f32
    %87 = vector.broadcast %cst_33 : f32 to vector<2x1xf32>
    %88 = arith.addf %86, %87 : vector<2x1xf32>
    %89 = math.rsqrt %88 : vector<2x1xf32>
    %90 = vector.broadcast %89 : vector<2x1xf32> to vector<2x128xf32>
    %91 = arith.mulf %81, %90 : vector<2x128xf32>
    %92 = vector.broadcast %7 : vector<1x128xf32> to vector<2x128xf32>
    %93 = arith.mulf %91, %92 : vector<2x128xf32>
    %94 = vector.broadcast %8 : vector<1x128xf32> to vector<2x128xf32>
    %95 = arith.addf %93, %94 : vector<2x128xf32>
    %c0_34 = arith.constant 0 : index
    %c384 = arith.constant 384 : index
    %96 = vector.load %arg6[%c0_34, %c384] : memref<2x512xf32, #tpu.memory_space<vmem>>, vector<2x128xf32>
    tpu.vector_store %arg6[%c0_34, %c384], %95 {strides = array<i32>} : memref<2x512xf32, #tpu.memory_space<vmem>>, vector<2x128xf32>,
    return
  }
  func.func @transform_0(%arg0: i32) -> (i32, i32) {
    %c0_i32 = arith.constant 0 : i32
    %c0_i32_0 = arith.constant 0 : i32
    %c0_i32_1 = arith.constant 0 : i32
    return %c0_i32, %c0_i32_0 : i32, i32
  }
  func.func @transform_1(%arg0: i32) -> (i32, i32, i32) {
    %c0_i32 = arith.constant 0 : i32
    %c0_i32_0 = arith.constant 0 : i32
    %c0_i32_1 = arith.constant 0 : i32
    return %arg0, %c0_i32, %c0_i32_0 : i32, i32, i32
  }
  func.func @transform_2(%arg0: i32) -> (i32, i32) {
    %c0_i32 = arith.constant 0 : i32
    %c0_i32_0 = arith.constant 0 : i32
    return %c0_i32, %arg0 : i32, i32
  }
  func.func @transform_3(%arg0: i32) -> (i32, i32) {
    %c0_i32 = arith.constant 0 : i32
    %c0_i32_0 = arith.constant 0 : i32
    %c0_i32_1 = arith.constant 0 : i32
    return %c0_i32, %c0_i32_0 : i32, i32
  }
  func.func @transform_4(%arg0: i32) -> (i32, i32) {
    %c0_i32 = arith.constant 0 : i32
    %c0_i32_0 = arith.constant 0 : i32
    %c0_i32_1 = arith.constant 0 : i32
    return %c0_i32, %c0_i32_0 : i32, i32
  }
  func.func @transform_5(%arg0: i32) -> (i32, i32) {
    %c0_i32 = arith.constant 0 : i32
    %c0_i32_0 = arith.constant 0 : i32
    return %c0_i32, %arg0 : i32, i32
  }
}

</mosaic_0001>

<bundles_post_ra>
// kernel: tpu_custom_call.1
= control target key start
LH: loop header
LB: loop body
LE: loop exit
PB: predicated region body
PF: predicated region fallthrough
CT: control target
= control target key end

     0   :  { %s1304_s0 = inlined_call_operand.hbm [shape: f32[2,64], index: 0, kind: input, shape index: {}]   ;;  %s1305_s1 = inlined_call_operand.hbm [shape: f32[2,64,512], index: 1, kind: input, shape index: {}]   ;;  %s1306_s2 = inlined_call_operand.hbm [shape: f32[1,1024], index: 2, kind: input, shape index: {}]   ;;  %s1307_s3 = inlined_call_operand.vmem [shape: f32[1,128], index: 3, kind: input, shape index: {}]   ;;  %s1308_s4 = inlined_call_operand.vmem [shape: f32[1,128], index: 4, kind: input, shape index: {}]   ;;  %s1309_s5 = inlined_call_operand.hbm [shape: f32[2,1024], index: 5, kind: output, shape index: {}]  }
   0x1   :  { %1315 = sst [smem:[#allocation12_spill]] %s1305_s1 }
   0x2   :  { %10 = vsyncpa [#allocation3], 0 }
   0x3   :  { %11 = vsyncpa [#allocation6], 0 }
   0x4   :  { %13 = vsyncpa [#allocation6 + $0x1], 0 }
   0x5   :  { %14 = vsyncpa [#allocation4], 0 }
   0x6   :  { %16 = vsyncpa [#allocation4 + $0x1], 0  ;;  %s1020_s18 = smov 0   ;;  %s1022_s19 = smov 0  }
   0x7   :  { %s1024_s20 = smov 0   ;;  %s1026_s21 = smov 0  }
   0x8 LB: > { %s1041_s22 = sadd.s32 1, %s981_s21   ;;  %s50_s23 = sadd.s32 1, %s977_s20  ;;  %s981_s21 = sphi %s1026_s21, %s1334_s21   ;;  %s977_s20 = sphi %s1024_s20, %s1333_s20   ;;  %s973_s19 = sphi %s1022_s19, %s1332_s19   ;;  %s969_s18 = sphi %s1020_s18, %s1331_s18  }
   0x9   : > { %s47_s24 = ssub.s32 %s981_s21, %s1041_s22  ;;  %p57_p0 = scmp.ne.s32.totalorder %s977_s20, %s973_s19 }
   0xa   : > { %p48_p1 = scmp.eq.s32.totalorder %s47_s24, 0  ;;  %p58_p2 = scmp.eq.s32.totalorder %s981_s21, 0 }
   0xb   : > { %p776_p4 = scmp.lt.s32.totalorder %s981_s21, 2  ;;  %s198_s26 = sand.u32 1, %s981_s21  }
   0xc   : > { %s1052_s25 = scalar_select %p48_p1, %s977_s20, %s50_s23  }
   0xd   : > { %p59_p5 = por %p58_p2, %p57_p0  ;;  %s200_s27 = sand.u32 1, %s977_s20  }
   0xe   : > { %s695_s28 = sshll.u32 %s200_s27, 8  ;;  %s715_s29 = sshll.u32 %s981_s21, 12 }
   0xf   : > { %s1316_s1 = sld [smem:[#allocation12_spill]]  ;;  %s202_s8 = scalar_lea.vmem [#allocation5], %s695_s28 }
  0x10   : > { %s209_s9 = sshll.u32 %s202_s8, 4  ;;  %p1067_p6 = pnand %p776_p4, %p59_p5  ;;  %s1071_s9 = int_to_ptr.vmem [resolvable:$true] %s209_s9 }
  0x11   : > { %s1073_s11 = scalar_lea.sflag [#allocation6], %s198_s26 }
  0x12   : > { %p825_p8 = pneg %p1067_p6 }
  0x15   : > { %s1065_s7 = scalar_lea.hbm %s1316_s1, %s715_s29  ;;  %s828_s15 = scalar_lea.hbm %s1316_s1, 8192 }
  0x16   : > { %s823_s12 = scalar_lea.hbm %s1065_s7, 4096  ;;  %p829_p11 = scmp.lt.u32.totalorder %s1065_s7, %s1316_s1 }
  0x17   : > { %p824_p7 = scmp.ne.s32.totalorder %s1065_s7, %s823_s12  ;;  %p830_p12 = scmp.lt.u32.totalorder %s828_s15, %s823_s12 }
  0x18   : > { %p832_p1 = scmp.lt.u32.totalorder %s823_s12, %s1065_s7 }
  0x19   : > { %p826_p9 = pnand %p825_p8, %p824_p7  ;;  %p831_p13 = por %p830_p12, %p829_p11 }
  0x1b   : > { %p827_p10 = pneg %p826_p9  ;;  %p833_p2 = por %p832_p1, %p831_p13 }
  0x1d   : > { %p834_p4 = pnand %p833_p2, %p827_p10 }
  0x1f   : > { %837 = shalt.err (!%p834_p4)
}
  0x20   : > { %s838_s23 = scalar_lea.vmem %s1071_s9, 4096  ;;  %s983_s24 = smov [#allocation5]  }
  0x21   : > { %p839_p5 = scmp.ne.s32.totalorder %s1071_s9, %s838_s23  ;;  %s843_s26 = sshll.u32 %s983_s24, 4  ;;  %s844_s26 = int_to_ptr.vmem [resolvable:$false] %s843_s26 }
  0x22   : > { %s845_s28 = scalar_lea.vmem %s844_s26, 8192  ;;  %p846_p3 = scmp.lt.s32.totalorder %s1071_s9, %s844_s26 }
  0x23   : > { %p841_p7 = pnand %p839_p5, %p825_p8  ;;  %p847_p11 = scmp.lt.s32.totalorder %s845_s28, %s838_s23 }
  0x25   : > { %p842_p9 = pneg %p841_p7  ;;  %p848_p12 = por %p847_p11, %p846_p3 }
  0x27   : > { %p849_p13 = pnand %p848_p12, %p842_p9 }
  0x29   : > { %852 = shalt.err (!%p849_p13)
}
  0x2a   : > { %s984_s29 = smov 512   ;;  %s985_s30 = smov 32  }
  0x2b   : > { %767 = dma.hbm_to_vmem [thread:$0]  (!%p1067_p6), %s1065_s7, 4096, %s1071_s9, %s1073_s11, %s984_s29, %s984_s29, %s985_s30  }
  0x2c   : > { %s1102_s6 = sadd.s32 4294967295, %s981_s21   ;;  %s691_s8 = sadd.s32 4294967294, %s981_s21  }
  0x2d   : > { %p63_p3 = scmp.ne.s32.totalorder %s973_s19, %s969_s18  ;;  %p1310_p10 = scmp.eq.s32.totalorder %s1102_s6, 0 }
  0x2e   : > { %p155_p1 = scmp.eq.s32.totalorder %s1102_s6, 1  ;;  %p161_p2 = scmp.eq.s32.totalorder %s691_s8, 1 }
  0x2f   : > { %p1111_p4 = por %p1310_p10, %p63_p3  ;;  %p692_p5 = scmp.ge.s32.totalorder %s981_s21, 1 }
  0x30   : > { %p1119_p7 = por %p155_p1, %p57_p0  ;;  %p1123_p9 = por %p161_p2, %p63_p3 }
  0x31   : > { %s1318_s12 = scalar_select %p1111_p4, 1, 0 }
  0x32   : > { %s1319_s7 = scalar_select %p1119_p7, 1, 0 }
  0x33   : > { %s1320_s9 = scalar_select %p1123_p9, 1, 0 }
  0x34   : > { %p168_p11 = scmp.lt.s32.totalorder %s981_s21, 3  ;;  %s698_s13 = sshll.u32 %s200_s27, 2 }
  0x35   : > { %s986_s15 = smov [#allocation2]   ;;  %s716_s17 = sshll.u32 %s981_s21, 6 }
  0x36   : > { %p1130_p12 = pnand %p692_p5, %p168_p11  ;;  %s181_s16 = sshll.u32 %s986_s15, 4  ;;  %s1134_s16 = int_to_ptr.vmem [resolvable:$true] %s181_s16 }
  0x37   : > { %s1142_s26 = scalar_lea.hbm %s1306_s2, %s716_s17  ;;  %s223_s27 = scalar_lea.vmem [#allocation7], %s698_s13 }
  0x38   : > { %s1321_s14 = scalar_select %p1130_p12, 1, 0 }
  0x39   : > { %p760_p0 = pneg %p1130_p12  ;;  %s231_s28 = sshll.u32 %s223_s27, 4  ;;  %s232_s28 = int_to_ptr.vmem [resolvable:$true] %s231_s28 }
  0x3a   : > { %s853_s30 = scalar_lea.hbm %s1142_s26, 64  ;;  %s858_s17 = scalar_lea.hbm %s1306_s2, 128 }
  0x3b   : > { %p1146_p13 = pnand %p760_p0, %p1310_p10  ;;  %p854_p3 = scmp.ne.s32.totalorder %s1142_s26, %s853_s30 }
  0x3c   : > { %p859_p5 = scmp.lt.u32.totalorder %s1142_s26, %s1306_s2  ;;  %p860_p11 = scmp.lt.u32.totalorder %s858_s17, %s853_s30 }
  0x3d   : > { %s1322_s29 = scalar_select %p1146_p13, 1, 0 }
  0x3e   : > { %p856_p1 = pnand %p854_p3, %p825_p8  ;;  %p861_p0 = por %p860_p11, %p859_p5 }
  0x3f   : > { %p862_p10 = scmp.lt.u32.totalorder %s853_s30, %s1142_s26 }
  0x40   : > { %p857_p2 = pneg %p856_p1 }
  0x41   : > { %p863_p9 = por %p862_p10, %p861_p0 }
  0x43   : > { %p864_p7 = pnand %p863_p9, %p857_p2 }
  0x45   : > { %867 = shalt.err (!%p864_p7)
}
  0x46   : > { %s868_s13 = scalar_lea.vmem %s232_s28, 64  ;;  %s987_s27 = smov [#allocation7]  }
  0x47   : > { %p869_p4 = scmp.ne.s32.totalorder %s232_s28, %s868_s13  ;;  %s873_s8 = sshll.u32 %s987_s27, 4  ;;  %s874_s8 = int_to_ptr.vmem [resolvable:$false] %s873_s8 }
  0x48   : > { %s875_s15 = scalar_lea.vmem %s874_s8, 128  ;;  %p876_p12 = scmp.lt.s32.totalorder %s232_s28, %s874_s8 }
  0x49   : > { %p871_p3 = pnand %p869_p4, %p825_p8  ;;  %p877_p13 = scmp.lt.s32.totalorder %s875_s15, %s868_s13 }
  0x4b   : > { %p872_p1 = pneg %p871_p3  ;;  %p878_p5 = por %p877_p13, %p876_p12 }
  0x4d   : > { %p879_p11 = pnand %p878_p5, %p872_p1 }
  0x4f   : > { %882 = shalt.err (!%p879_p11)
}
  0x50   : > { %770 = dma.hbm_to_vmem [thread:$0]  (!%p1067_p6), %s1142_s26, 64, %s232_s28, %s1073_s11  }
  0x51   : > { %s883_s23 = scalar_lea.hbm %s1304_s0, 32  ;;  %p1323_p10 = scmp.ne.s32.totalorder %s1322_s29, 0 }
  0x52   : > { %p884_p8 = scmp.ne.s32.totalorder %s1304_s0, %s883_s23  ;;  %p890_p12 = scmp.lt.u32.totalorder %s883_s23, %s1304_s0 }
  0x53   : > { %p885_p4 = pneg %p1323_p10 }
  0x55   : > { %p886_p7 = pnand %p885_p4, %p884_p8 }
  0x57   : > { %p887_p9 = pneg %p886_p7 }
  0x59   : > { %p892_p13 = pnand %p890_p12, %p887_p9 }
  0x5b   : > { %895 = shalt.err (!%p892_p13)
}
  0x5c   : > { %s896_s10 = scalar_lea.vmem %s1134_s16, 32  ;;  %p904_p3 = scmp.lt.s32.totalorder %s1134_s16, %s1134_s16 }
  0x5d   : > { %p897_p6 = scmp.ne.s32.totalorder %s1134_s16, %s896_s10  ;;  %p905_p1 = scmp.lt.s32.totalorder %s896_s10, %s896_s10 }
  0x5f   : > { %p899_p2 = pnand %p897_p6, %p885_p4  ;;  %p906_p5 = por %p905_p1, %p904_p3 }
  0x61   : > { %p900_p0 = pneg %p899_p2 }
  0x63   : > { %p907_p11 = pnand %p906_p5, %p900_p0 }
  0x65   : > { %910 = shalt.err (!%p907_p11)
}
  0x66   : > { %763 = dma.hbm_to_vmem [thread:$0]  (!%p1323_p10), %s1304_s0, 32, %s1134_s16, [#allocation3]  }
  0x67   : > { %p1324_p8 = scmp.ne.s32.totalorder %s1321_s14, 0 }
  0x68   : > { %p1325_p7 = scmp.eq.s32.totalorder (!%p1324_p8), %s1102_s6, 0 }
  0x69   : > { %240 = sbr.rel (%p1324_p8) target bundleno = 687 (0x2af), region = 40 }
  0x70   : > { %956 = dma.done.wait (%p1325_p7), [#allocation3], 32   ;;  %p1326_p4 = pmov %p1325_p7 }
  0x71   : > { %s246_s26 = sand.u32 1, %s1102_s6   ;;  %s1199_s28 = sand.u32 1, %s973_s19  }
  0x72   : > { %958 = vsyncadd (%p1326_p4), [#allocation3], 4294967264  ;;  %s703_s29 = sshll.u32 %s1199_s28, 8  ;;  %s247_s8 = scalar_lea.sflag [#allocation6], %s246_s26 }
  0x73   : > { %s1202_s15 = scalar_lea.vmem [#allocation5], %s703_s29  ;;  %p1327_p10 = scmp.ne.s32.totalorder %s1318_s12, 0 }
  0x75   : > { %960 = dma.done.wait (%p1327_p10), %s247_s8, 4160  }
  0x76   : > { %962 = vsyncadd (%p1327_p10), %s247_s8, 4294963136  ;;  %v988_v0 = vmov 0.0   ;;  %v295_v1 = vld [vmem:[%s1202_s15 + $0x8] sm:$0xff]  ;;  %v297_v3 = vld [vmem:[%s1202_s15 + $0x18] sm:$0xff]  ;;  %vm348_vm0 = vcmask 523264   ;;  %v328_v50 = vlaneseq  ;;  %s704_s12 = sshll.u32 %s1199_s28, 2 }
  0x77   : > { %416 = vmatprep.mubr.f32.mxu0 %v988_v0  ;;  %487 = vmatprep.mubr.f32.mxu1 %v988_v0  ;;  %v299_v2 = vld [vmem:[%s1202_s15 + $0x28] sm:$0xff]  ;;  %v301_v5 = vld [vmem:[%s1202_s15 + $0x38] sm:$0xff]  ;;  %v294_v6 = vld [vmem:[%s1202_s15] sm:$0xff]  ;;  %s259_s14 = scalar_lea.vmem [#allocation7], %s704_s12  ;;  %vm496_vm1 = vcmask 1041408   ;;  %s705_s17 = sshll.u32 %s1199_s28, 3 }
  0x78   : > { %v718_v4 = vpack.c.bf16 %v299_v2, %v295_v1  ;;  %v298_v7 = vld [vmem:[%s1202_s15 + $0x20] sm:$0xff]  ;;  %v734_v8 = vpack.c.bf16 %v301_v5, %v297_v3  ;;  %v296_v10 = vld [vmem:[%s1202_s15 + $0x10] sm:$0xff]  ;;  %v303_v12 = vld [vmem:[%s1202_s15 + $0x48] sm:$0xff]  ;;  %v329_v51 = vshrl.u32 %v328_v50, 7  ;;  %s290_s13 = scalar_lea.vmem [#allocation8], %s705_s17  ;;  %s717_s27 = sshll.u32 %s1102_s6, 7 }
  0x79   : > { %v720_v9 = vpack.c.bf16 %v298_v7, %v294_v6  ;;  %v300_v11 = vld [vmem:[%s1202_s15 + $0x30] sm:$0xff]  ;;  %v307_v14 = vld [vmem:[%s1202_s15 + $0x68] sm:$0xff]  ;;  %v305_v15 = vld [vmem:[%s1202_s15 + $0x58] sm:$0xff]  ;;  %s589_s10 = sshll.u32 %s290_s13, 4  ;;  %s1260_s26 = scalar_lea.hbm %s1309_s5, %s717_s27  ;;  %s1262_s10 = int_to_ptr.vmem [resolvable:$true] %s589_s10 }
  0x7a   : > { %719 = vmatprep.subr.bf16.mxu0 %v718_v4  ;;  %v736_v13 = vpack.c.bf16 %v300_v11, %v296_v10  ;;  %v309_v16 = vld [vmem:[%s1202_s15 + $0x78] sm:$0xff]  ;;  %735 = vmatprep.subr.bf16.mxu1 %v734_v8  ;;  %v722_v17 = vpack.c.bf16 %v307_v14, %v303_v12  ;;  %v302_v19 = vld [vmem:[%s1202_s15 + $0x40] sm:$0xff]  ;;  %v304_v21 = vld [vmem:[%s1202_s15 + $0x50] sm:$0xff]  ;;  %v330_v52 = vsub.s32 0, %v329_v51  ;;  %v338_v54 = vsub.s32 2, %v329_v51  ;;  %s575_s29 = scalar_lea.sflag [#allocation4], %s1199_s28 }
  0x7b   : > { %721 = vmatpush1.bf16.msra.mxu0 %v720_v9  ;;  %v738_v18 = vpack.c.bf16 %v309_v16, %v305_v15  ;;  %v306_v20 = vld [vmem:[%s1202_s15 + $0x60] sm:$0xff]  ;;  %v308_v23 = vld [vmem:[%s1202_s15 + $0x70] sm:$0xff]  ;;  %v311_v24 = vld [vmem:[%s1202_s15 + $0x88] sm:$0xff]  ;;  %v334_v55 = vsub.s32 1, %v329_v51  ;;  %v342_v56 = vsub.s32 3, %v329_v51  ;;  %s911_s8 = scalar_lea.vmem %s1262_s10, 128 }
  0x7c   : > { %737 = vmatpush1.bf16.msra.mxu1 %v736_v13  ;;  %v724_v22 = vpack.c.bf16 %v306_v20, %v302_v19  ;;  %v315_v25 = vld [vmem:[%s1202_s15 + $0xa8] sm:$0xff]  ;;  %723 = vmatprep.subr.bf16.mxu0 %v722_v17  ;;  %v740_v26 = vpack.c.bf16 %v308_v23, %v304_v21  ;;  %v313_v28 = vld [vmem:[%s1202_s15 + $0x98] sm:$0xff]  ;;  %v310_v30 = vld [vmem:[%s1202_s15 + $0x80] sm:$0xff]  ;;  %p912_p9 = scmp.ne.s32.totalorder %s1262_s10, %s911_s8  ;;  %p1328_p12 = scmp.ne.s32.totalorder %s1319_s7, 0 }
  0x7d   : > { %739 = vmatprep.subr.bf16.mxu1 %v738_v18  ;;  %v726_v27 = vpack.c.bf16 %v315_v25, %v311_v24  ;;  %v317_v29 = vld [vmem:[%s1202_s15 + $0xb8] sm:$0xff]  ;;  %v314_v32 = vld [vmem:[%s1202_s15 + $0xa0] sm:$0xff]  ;;  %v312_v33 = vld [vmem:[%s1202_s15 + $0x90] sm:$0xff]  ;;  %s989_s6 = smov [#allocation8]  }
  0x7e   : > { %v742_v31 = vpack.c.bf16 %v317_v29, %v313_v28  ;;  %v316_v34 = vld [vmem:[%s1202_s15 + $0xb0] sm:$0xff]  ;;  %v728_v35 = vpack.c.bf16 %v314_v32, %v310_v30  ;;  %v319_v36 = vld [vmem:[%s1202_s15 + $0xc8] sm:$0xff]  ;;  %v321_v38 = vld [vmem:[%s1202_s15 + $0xd8] sm:$0xff]  ;;  %p913_p13 = pnand %p912_p9, %p1328_p12 }
  0x7f   : > { %725 = vmatpush1.bf16.msra.mxu0 %v724_v22  ;;  %v323_v37 = vld [vmem:[%s1202_s15 + $0xe8] sm:$0xff]  ;;  %v744_v39 = vpack.c.bf16 %v316_v34, %v312_v33  ;;  %v325_v41 = vld [vmem:[%s1202_s15 + $0xf8] sm:$0xff]  ;;  %v318_v42 = vld [vmem:[%s1202_s15 + $0xc0] sm:$0xff] }
  0x80   : > { %741 = vmatpush1.bf16.msra.mxu1 %v740_v26  ;;  %727 = vmatprep.subr.bf16.mxu0 %v726_v27  ;;  %v730_v40 = vpack.c.bf16 %v323_v37, %v319_v36  ;;  %v322_v43 = vld [vmem:[%s1202_s15 + $0xe0] sm:$0xff]  ;;  %v746_v44 = vpack.c.bf16 %v325_v41, %v321_v38  ;;  %v320_v45 = vld [vmem:[%s1202_s15 + $0xd0] sm:$0xff]  ;;  %v293_v49 = vld [vmem:[#allocation2] sm:$0x3]  ;;  %p914_p6 = pneg %p913_p13 }
  0x81   : > { %743 = vmatprep.subr.bf16.mxu1 %v742_v31  ;;  %v324_v46 = vld [vmem:[%s1202_s15 + $0xf0] sm:$0xff]  ;;  %v732_v47 = vpack.c.bf16 %v322_v43, %v318_v42  ;;  %v326_v53 = vld [vmem:[%s259_s14] sm:$0xf]  ;;  %v708_v42 = vld [vmem:[%s1307_s3] ss:$0 sm:$0xff]  ;;  %s915_s15 = sshll.u32 %s989_s6, 4  ;;  %s916_s15 = int_to_ptr.vmem [resolvable:$false] %s915_s15 }
  0x82   : > { %v748_v48 = vpack.c.bf16 %v324_v46, %v320_v45  ;;  %v331_v57 = vrot.slane %v326_v53, %v330_v52  ;;  %v339_v58 = vrot.slane %v326_v53, %v338_v54  ;;  %v335_v59 = vrot.slane %v326_v53, %v334_v55  ;;  %s917_s12 = scalar_lea.vmem %s916_s15, 256  ;;  %p918_p2 = scmp.lt.s32.totalorder %s1262_s10, %s916_s15 }
  0x83   : > { %729 = vmatpush1.bf16.msra.mxu0 %v728_v35  ;;  %v343_v60 = vrot.slane %v326_v53, %v342_v56  ;;  %p919_p0 = scmp.lt.s32.totalorder %s917_s12, %s911_s8 }
  0x84   : > { %745 = vmatpush1.bf16.msra.mxu1 %v744_v39  ;;  %731 = vmatprep.subr.bf16.mxu0 %v730_v40 }
  0x85   : > { %747 = vmatprep.subr.bf16.mxu1 %v746_v44  ;;  %v709_v44 = vld [vmem:[%s1308_s4] ss:$0 sm:$0xff]  ;;  %p920_p3 = por %p919_p0, %p918_p2 }
  0x87   : > { %733 = vmatpush1.bf16.msra.mxu0 %v732_v47  ;;  %p921_p1 = pnand %p920_p3, %p914_p6 }
  0x88   : > { %749 = vmatpush1.bf16.msra.mxu1 %v748_v48 }
  0x8a   : > { %706 = vmatmul.mubr.msk.f32.vlgmr.msra.gmra.mrb[0].mxu0 %vm348_vm0, %v293_v49 }
  0x8b   : > { %707 = vmatmul.mubr.msk.f32.vlgmr.msra.gmra.mrb[0].mxu1 %vm348_vm0, %v293_v49 }
 0x15d   : > { %v418_v61 = vpop.f32.mrb[0].mxu0 }
 0x15e   : > { %v419_v62 = vadd.f32 %v418_v61, %v331_v57  ;;  %v489_v63 = vpop.f32.mrb[0].mxu1  ;;  %v420_v0 = vpop.f32.mrb[1].mxu0 }
 0x15f   : > { %v490_v1 = vadd.f32 %v489_v63, %v339_v58  ;;  %v491_v2 = vpop.f32.mrb[1].mxu1  ;;  %v421_v3 = vadd.f32 %v420_v0, %v335_v59 }
 0x160   : > { %v492_v4 = vadd.f32 %v491_v2, %v343_v60  ;;  %v497_v5 = vsel %vm496_vm1, %v419_v62, 0.0 }
 0x161   : > { %v542_v6 = vsel %vm496_vm1, %v490_v1, 0.0  ;;  %498 = vadd.xlane.f32.xlu0 %v497_v5  ;;  %v526_v8 = vsel %vm496_vm1, %v421_v3, 0.0 }
 0x162   : > { %543 = vadd.xlane.f32.xlu1 %v542_v6  ;;  %v558_v7 = vsel %vm496_vm1, %v492_v4, 0.0 }
 0x165   : > { %527 = vadd.xlane.f32.xlu0 %v526_v8 }
 0x166   : > { %559 = vadd.xlane.f32.xlu1 %v558_v7 }
 0x1ee   : > { %v499_v9 = vpop.xlane.xlu0 %498 }
 0x1ef   : > { %v544_v10 = vpop.xlane.xlu1 %543  ;;  %v501_v11 = vmul.f32 0.0078125, %v499_v9 }
 0x1f0   : > { %v545_v12 = vmul.f32 0.0078125, %v544_v10 }
 0x1f1   : > { %v502_v13 = vsub.f32 %v419_v62, %v501_v11 }
 0x1f2   : > { %v546_v14 = vsub.f32 %v490_v1, %v545_v12  ;;  %v528_v15 = vpop.xlane.xlu0 %527 }
 0x1f3   : > { %v560_v16 = vpop.xlane.xlu1 %559  ;;  %v529_v17 = vmul.f32 0.0078125, %v528_v15  ;;  %v503_v18 = vmul.f32 %v502_v13, %v502_v13 }
 0x1f4   : > { %v561_v19 = vmul.f32 0.0078125, %v560_v16  ;;  %v547_v22 = vmul.f32 %v546_v14, %v546_v14 }
 0x1f5   : > { %v530_v20 = vsub.f32 %v421_v3, %v529_v17  ;;  %v504_v21 = vsel %vm496_vm1, %v503_v18, 0.0 }
 0x1f6   : > { %v562_v23 = vsub.f32 %v492_v4, %v561_v19  ;;  %505 = vadd.xlane.f32.xlu0 %v504_v21  ;;  %v548_v25 = vsel %vm496_vm1, %v547_v22, 0.0 }
 0x1f7   : > { %v531_v24 = vmul.f32 %v530_v20, %v530_v20 }
 0x1f8   : > { %v563_v27 = vmul.f32 %v562_v23, %v562_v23 }
 0x1f9   : > { %v532_v26 = vsel %vm496_vm1, %v531_v24, 0.0 }
 0x1fa   : > { %549 = vadd.xlane.f32.xlu0 %v548_v25  ;;  %533 = vadd.xlane.f32.xlu1 %v532_v26  ;;  %v564_v28 = vsel %vm496_vm1, %v563_v27, 0.0 }
 0x1fe   : > { %565 = vadd.xlane.f32.xlu1 %v564_v28 }
 0x283   : > { %v506_v29 = vpop.xlane.xlu0 %505 }
 0x284   : > { %v507_v30 = vmul.f32 0.0078125, %v506_v29 }
 0x286   : > { %v508_v31 = vadd.f32 1e-05, %v507_v30 }
 0x287   : > { %v534_v32 = vpop.xlane.xlu1 %533  ;;  %v550_v33 = vpop.xlane.xlu0 %549 }
 0x288   : > { %815 = vrsqrt.f32 %v508_v31  ;;  %v535_v34 = vmul.f32 0.0078125, %v534_v32  ;;  %v551_v35 = vmul.f32 0.0078125, %v550_v33 }
 0x28a   : > { %v536_v36 = vadd.f32 1e-05, %v535_v34  ;;  %v552_v37 = vadd.f32 1e-05, %v551_v35 }
 0x28b   : > { %v566_v38 = vpop.xlane.xlu1 %565 }
 0x28c   : > { %817 = vrsqrt.f32 %v536_v36  ;;  %v567_v39 = vmul.f32 0.0078125, %v566_v38 }
 0x28d   : > { %819 = vrsqrt.f32 %v552_v37 }
 0x28e   : > { %v568_v40 = vadd.f32 1e-05, %v567_v39 }
 0x290   : > { %821 = vrsqrt.f32 %v568_v40 }
 0x292   : > { %v816_v41 = vpop.eup %815 }
 0x293   : > { %v510_v43 = vmul.f32 %v816_v41, %v502_v13 }
 0x295   : > { %v517_v45 = vmul.f32 %v708_v42, %v510_v43 }
 0x296   : > { %v818_v46 = vpop.eup %817 }
 0x297   : > { %v820_v47 = vpop.eup %819  ;;  %v524_v48 = vadd.f32 %v709_v44, %v517_v45  ;;  %v538_v49 = vmul.f32 %v818_v46, %v530_v20 }
 0x298   : > { %v554_v50 = vmul.f32 %v820_v47, %v546_v14 }
 0x299   : > { %v539_v51 = vmul.f32 %v708_v42, %v538_v49  ;;  %525 = vst [vmem:[%s290_s13] sm:$0x3] %v524_v48 }
 0x29a   : > { %v822_v52 = vpop.eup %821  ;;  %v555_v53 = vmul.f32 %v708_v42, %v554_v50 }
 0x29b   : > { %v540_v54 = vadd.f32 %v709_v44, %v539_v51  ;;  %v570_v55 = vmul.f32 %v822_v52, %v562_v23 }
 0x29c   : > { %v556_v56 = vadd.f32 %v709_v44, %v555_v53 }
 0x29d   : > { %v571_v57 = vmul.f32 %v708_v42, %v570_v55  ;;  %541 = vst [vmem:[%s290_s13 + $0x2] sm:$0x3] %v540_v54 }
 0x29e   : > { %557 = vst [vmem:[%s290_s13 + $0x4] sm:$0x3] %v556_v56 }
 0x29f   : > { %v572_v58 = vadd.f32 %v709_v44, %v571_v57 }
 0x2a1   : > { %573 = vst [vmem:[%s290_s13 + $0x6] sm:$0x3] %v572_v58 }
 0x2a2   : > { %924 = shalt.err (!%p921_p1)
}
 0x2a3   : > { %s925_s28 = scalar_lea.hbm %s1260_s26, 128  ;;  %s929_s30 = scalar_lea.hbm %s1309_s5, 256 }
 0x2a4   : > { %p926_p5 = scmp.ne.s32.totalorder %s1260_s26, %s925_s28  ;;  %p930_p7 = scmp.lt.u32.totalorder %s1260_s26, %s1309_s5 }
 0x2a5   : > { %p931_p4 = scmp.lt.u32.totalorder %s929_s30, %s925_s28  ;;  %p933_p9 = scmp.lt.u32.totalorder %s925_s28, %s1260_s26 }
 0x2a6   : > { %p927_p11 = pnand %p926_p5, %p1328_p12 }
 0x2a7   : > { %p932_p10 = por %p931_p4, %p930_p7 }
 0x2a8   : > { %p928_p8 = pneg %p927_p11 }
 0x2a9   : > { %p934_p13 = por %p933_p9, %p932_p10 }
 0x2ab   : > { %p935_p6 = pnand %p934_p13, %p928_p8 }
 0x2ad   : > { %938 = shalt.err (!%p935_p6)
}
 0x2ae   : > { %758 = dma.vmem_to_hbm [thread:$0]  (%p1328_p12), %s1262_s10, 128, %s1260_s26, %s575_s29  }
 0x2af PF: > { %s601_s24 = sand.u32 1, %s969_s18   ;;  %p1329_p2 = scmp.ne.s32.totalorder %s1320_s9, 0 }
 0x2b0   : > { %p1330_p0 = scmp.ge.s32.totalorder %s981_s21, 2  ;;  %s602_s13 = scalar_lea.sflag [#allocation4], %s601_s24 }
 0x2b2   : > { %p772_p3 = pnand %p1330_p0, %p1329_p2 }
 0x2b4   : > { %964 = dma.done.wait (!%p772_p3), %s602_s13, 128  }
 0x2b5   : > { %966 = vsyncadd (!%p772_p3), %s602_s13, 4294967168  ;;  %p19_p1 = scmp.ge.s32.totalorder %s1041_s22, 4   ;;  %s1331_s18 = smov %s973_s19 }
 0x2b6   : > { %s1332_s19 = smov %s977_s20  ;;  %s1333_s20 = smov %s1052_s25 }
 0x2b7   : > { %s1334_s21 = smov %s1041_s22  ;;  %21 = sbr.rel (!%p19_p1) target bundleno = 8 (0x8), region = 101 }
 0x2be   :  { %607 = vsyncpa [#allocation3], 1 }
 0x2bf   :  { %609 = vsyncpa [#allocation3 + $0x1], 1 }
 0x2c0   :  { %610 = vsyncpa [#allocation6], 1 }
 0x2c1   :  { %612 = vsyncpa [#allocation6 + $0x1], 1 }
 0x2c2   :  { %613 = vsyncpa [#allocation4], 1 }
 0x2c3   :  { %615 = vsyncpa [#allocation4 + $0x1], 1 }

</bundles_post_ra>
